<compile_context>
chip_gen: v7x
topology: tpu7x:2x2x1
jax: 0.10.0
libtpu: 0.0.40
codegen_flags: <defaults>
</compile_context>

<pallas_src>
import functools

import jax
import jax.numpy as jnp
from jax import lax
from jax.experimental import pallas as pl
from jax.experimental.pallas import tpu as pltpu

NEG_SLOPE = 0.01
BN_EPS = 1e-5


def _leaky(x):
    return jnp.where(x >= 0, x, NEG_SLOPE * x)


# ----------------------------- fused Pallas kernel ---------------------------

def _decoder_kernel(z_ref, w_ref, b_ref, o_ref, *, n_layers, c_out, h_out, w_out):
    # z_ref : (N, D)          zero-padded latent (D = common padded width)
    # w_ref : (L, D, D)       zero-padded layer matrices (FC + folded deconv+BN)
    # b_ref : (L, D)          zero-padded bias / shift rows
    # o_ref : (N, c*h*w)      softmax(dim=h) output, flat (c, h, w) row-major
    h = z_ref[...]                                   # (N, D)
    b_all = b_ref[...]                               # (L, D)

    for l in range(n_layers):                        # Linear/ConvT(+BN folded) chain
        h = jnp.dot(h, w_ref[l], preferred_element_type=jnp.float32) + b_all[l:l + 1, :]
        if l < n_layers - 1:                         # LeakyReLU on all but last layer
            h = _leaky(h)                            # Dropout == identity (eval)

    out_width = c_out * h_out * w_out
    if h.shape[1] != out_width:                      # drop pad columns (no-op here)
        h = h[:, :out_width]

    # Softmax over the height axis (PyTorch dim=2). Groups are w_out-wide lane slices.
    hw = h_out * w_out
    mx_parts, = ([],)
    for c in range(c_out):
        base = c * hw
        rows = [h[:, base + i * w_out: base + (i + 1) * w_out] for i in range(h_out)]
        mx = rows[0]
        for r in rows[1:]:
            mx = jnp.maximum(mx, r)
        mx_parts.append(jnp.concatenate([mx] * h_out, axis=1))
    mx_full = mx_parts[0] if c_out == 1 else jnp.concatenate(mx_parts, axis=1)

    p = jnp.exp(h - mx_full)                         # single full-width EUP exp

    den_parts = []
    for c in range(c_out):
        base = c * hw
        rows = [p[:, base + i * w_out: base + (i + 1) * w_out] for i in range(h_out)]
        den = rows[0]
        for r in rows[1:]:
            den = den + r
        den_parts.append(jnp.concatenate([den] * h_out, axis=1))
    den_full = den_parts[0] if c_out == 1 else jnp.concatenate(den_parts, axis=1)

    inv = pl.reciprocal(den_full, approx=True)       # EUP vrcp
    inv = inv * (2.0 - den_full * inv)               # one Newton step -> ~1e-6 rel err
    o_ref[...] = p * inv                             # single full-width store


_VMEM = pl.BlockSpec(memory_space=pltpu.MemorySpace.VMEM)


def decoder_forward(z, params, out_chw):
    n = z.shape[0]
    c_out, h_out, w_out = out_chw
    out_width = c_out * h_out * w_out
    layers = params["fc"] + params["deconv"]         # [(mat, shift_row), ...]
    n_layers = len(layers)

    # Common padded width for the whole chain.
    d_max = z.shape[1]
    for w, _ in layers:
        d_max = max(d_max, w.shape[0], w.shape[1])

    # Pack: one (L, D, D) weight stack, one (L, D) bias stack, one padded z.
    w_stack = jnp.stack([
        jnp.zeros((d_max, d_max), jnp.float32).at[:w.shape[0], :w.shape[1]].set(w)
        for w, _ in layers])
    b_stack = jnp.stack([
        jnp.zeros((d_max,), jnp.float32).at[:b.shape[-1]].set(jnp.reshape(b, (-1,)))
        for _, b in layers])
    z_pad = jnp.zeros((n, d_max), jnp.float32).at[:, :z.shape[1]].set(z)

    flops = 2 * n * n_layers * d_max * d_max
    transcendentals = 2 * n * out_width              # exp + reciprocal
    bytes_accessed = 4 * (w_stack.size + b_stack.size + z_pad.size + n * out_width)

    kern = functools.partial(
        _decoder_kernel,
        n_layers=n_layers, c_out=c_out, h_out=h_out, w_out=w_out)

    y = pl.pallas_call(
        kern,
        out_shape=jax.ShapeDtypeStruct((n, out_width), jnp.float32),
        in_specs=[_VMEM, _VMEM, _VMEM],
        out_specs=_VMEM,
        compiler_params=pltpu.CompilerParams(vmem_limit_bytes=4 * 1024 * 1024),
        cost_estimate=pl.CostEstimate(
            flops=flops, transcendentals=transcendentals,
            bytes_accessed=bytes_accessed),
    )(z_pad, w_stack, b_stack)
    return y.reshape(n, c_out, h_out, w_out)


# --------------------------- param prep / reference --------------------------

def _conv_transpose_nchw(x, w, stride_w, pad_w, out_pad_w):
    """PyTorch ConvTranspose2d (stride=(1,stride_w), padding=(0,pad_w),
    output_padding=(0,out_pad_w)); x NCHW, w (in_ch, out_ch, kh, kw)."""
    kh, kw = w.shape[2], w.shape[3]
    w_conv = jnp.flip(w, axis=(2, 3)).transpose(1, 0, 2, 3)      # (out_ch, in_ch, kh, kw)
    return lax.conv_general_dilated(
        x, w_conv, window_strides=(1, 1),
        padding=((kh - 1, kh - 1), (kw - 1 - pad_w, kw - 1 - pad_w + out_pad_w)),
        lhs_dilation=(1, stride_w),
        dimension_numbers=("NCHW", "OIHW", "NCHW"))


def _deconv_as_matrix(w, stride_w, pad_w, out_pad_w, in_ch, w_in):
    """Fold a ConvTranspose2d acting on (in_ch, 1, w_in) into a dense matrix."""
    eye = jnp.eye(in_ch * w_in, dtype=jnp.float32).reshape(in_ch * w_in, in_ch, 1, w_in)
    out = _conv_transpose_nchw(eye, w, stride_w, pad_w, out_pad_w)
    c_o, h_o, w_o = out.shape[1], out.shape[2], out.shape[3]
    return out.reshape(in_ch * w_in, c_o * h_o * w_o), (c_o, h_o, w_o)


def reference_forward(z, raw, cfg):
    h = z
    for w, b in raw["fc"]:
        h = _leaky(h @ w.T + b)                              # Dropout == identity (eval)
    n = h.shape[0]
    x = h.reshape(n, -1, 1, cfg["compressed_seq_len"])
    for (w, b, bn), stride, pad, opad in zip(raw["deconv"], cfg["strides"],
                                             cfg["pads"], cfg["out_pads"]):
        x = _conv_transpose_nchw(x, w, stride, pad, opad) + b[None, :, None, None]
        if bn is not None:
            gamma, beta, rmean, rvar = bn
            x = (x - rmean[None, :, None, None]) * (
                gamma[None, :, None, None] / jnp.sqrt(rvar[None, :, None, None] + BN_EPS))
            x = x + beta[None, :, None, None]
            x = _leaky(x)                                    # Dropout == identity (eval)
    return jax.nn.softmax(x, axis=2)


# ------------------------------------ main ------------------------------------

if __name__ == "__main__":
    # Small hyperparameters consistent with the module:
    latent_dim = 8
    num_channels = [1, 8, 16]
    kernel_widths = [5, 3]
    pooling_widths = [2, 2]
    paddings = [2, 1]
    out_paddings = [1, 1]
    fc_layers = [32]
    fc_input = 64
    compressed_seq_len = 4
    # fc: 8 -> 32 -> 64 ; view -> (N,16,1,4)
    # deconv0: ConvT(16->8,(1,3),s(1,2),p(0,1),op(0,1)) + BN + LeakyReLU -> (N,8,1,8)
    # deconv1: ConvT(8->1,(4,5),s(1,2),p(0,2),op(0,1))                   -> (N,1,4,16)
    # output_activation: Softmax(dim=2)

    key = jax.random.PRNGKey(0)
    keys = iter(jax.random.split(key, 64))

    raw = {"fc": [], "deconv": []}
    params = {"fc": [], "deconv": []}

    # ---- decoder_fc: reversed Linear + LeakyReLU + Dropout ----
    fc_full = [fc_input] + fc_layers + [latent_dim]
    fc_dims = list(zip(reversed(fc_full[1:]), reversed(fc_full[:-1])))   # [(8,32),(32,64)]
    for din, dout in fc_dims:
        w = 0.1 * jax.random.normal(next(keys), (dout, din), jnp.float32)
        b = 0.1 * jax.random.normal(next(keys), (dout,), jnp.float32)
        raw["fc"].append((w, b))
        params["fc"].append((w.T, b[None, :]))

    # ---- deconv stack ----
    rev_in = list(reversed(num_channels[1:]))       # [16, 8]
    rev_out = list(reversed(num_channels[:-1]))     # [8, 1]
    rev_kw = list(reversed(kernel_widths))          # [3, 5]
    rev_pad = list(reversed(paddings))              # [1, 2]
    rev_stride = list(reversed(pooling_widths))     # [2, 2]
    n_deconv = len(rev_in)

    cfg = {"compressed_seq_len": compressed_seq_len,
           "strides": rev_stride, "pads": rev_pad, "out_pads": out_paddings}

    w_in_cur = compressed_seq_len
    out_chw = None
    for num in range(n_deconv):
        in_ch, out_ch = rev_in[num], rev_out[num]
        kh = 1 if num < len(num_channels) - 2 else 4
        kw = rev_kw[num]
        w = 0.1 * jax.random.normal(next(keys), (in_ch, out_ch, kh, kw), jnp.float32)
        b = 0.1 * jax.random.normal(next(keys), (out_ch,), jnp.float32)
        if num < len(num_channels) - 2:             # followed by BN + LeakyReLU + Dropout
            gamma = 1.0 + 0.1 * jax.random.normal(next(keys), (out_ch,), jnp.float32)
            beta = 0.1 * jax.random.normal(next(keys), (out_ch,), jnp.float32)
            rmean = 0.1 * jax.random.normal(next(keys), (out_ch,), jnp.float32)
            rvar = jax.random.uniform(next(keys), (out_ch,), jnp.float32, 0.5, 1.5)
            bn = (gamma, beta, rmean, rvar)
        else:
            bn = None
        raw["deconv"].append((w, b, bn))

        mat, (c_o, h_o, w_o) = _deconv_as_matrix(
            w, rev_stride[num], rev_pad[num], out_paddings[num], in_ch, w_in_cur)
        hw = h_o * w_o
        if bn is not None:                          # fold bias + eval BN into mat/shift
            gamma, beta, rmean, rvar = bn
            scale_c = gamma / jnp.sqrt(rvar + BN_EPS)
            shift_c = (b - rmean) * scale_c + beta
            mat = mat * jnp.repeat(scale_c, hw)[None, :]
            shift = jnp.repeat(shift_c, hw)[None, :]
        else:
            shift = jnp.repeat(b, hw)[None, :]
        params["deconv"].append((mat, shift))
        w_in_cur = w_o
        out_chw = (c_o, h_o, w_o)

    z = jax.random.normal(jax.random.PRNGKey(1), (2, latent_dim), jnp.float32)

    out = decoder_forward(z, params, out_chw)
    out = jax.block_until_ready(out)

    out_ref = reference_forward(z, raw, cfg)
    assert out.shape == (2,) + out_chw, (out.shape, out_chw)
    assert jnp.allclose(out, out_ref, rtol=1e-4, atol=1e-4), float(jnp.max(jnp.abs(out - out_ref)))
    assert jnp.allclose(out.sum(axis=2), 1.0, atol=1e-4)

    print("KERNEL_OK")
</pallas_src>

<mosaic_0001>
module attributes {stable_mosaic.version = 11 : i64} {
  func.func @_decoder_kernel(%arg0: memref<2x64xf32, #tpu.memory_space<vmem>>, %arg1: memref<4x64x64xf32, #tpu.memory_space<vmem>>, %arg2: memref<4x64xf32, #tpu.memory_space<vmem>>, %arg3: memref<2x64xf32, #tpu.memory_space<vmem>>) attributes {dimension_semantics = [], scalar_prefetch = 0 : i64, scratch_operands = 0 : i64, tpu.core_type = #tpu.core_type<tc>} {
    %c0 = arith.constant 0 : index
    %c0_0 = arith.constant 0 : index
    %0 = vector.load %arg0[%c0, %c0_0] : memref<2x64xf32, #tpu.memory_space<vmem>>, vector<2x64xf32>
    %c0_1 = arith.constant 0 : index
    %c0_2 = arith.constant 0 : index
    %1 = vector.load %arg2[%c0_1, %c0_2] : memref<4x64xf32, #tpu.memory_space<vmem>>, vector<4x64xf32>
    %c0_3 = arith.constant 0 : index
    %c0_4 = arith.constant 0 : index
    %c0_5 = arith.constant 0 : index
    %2 = vector.load %arg1[%c0_3, %c0_4, %c0_5] : memref<4x64x64xf32, #tpu.memory_space<vmem>>, vector<1x64x64xf32>
    %3 = vector.shape_cast %2 : vector<1x64x64xf32> to vector<64x64xf32>
    %cst = arith.constant dense<0.000000e+00> : vector<2x64xf32>
    %4 = tpu.matmul %0, %3, %cst {dimension_numbers = #tpu.dot_dimension_numbers<[1], [0], [0], [1], [0, 0, 1, 1], [], []>} : vector<2x64xf32>, vector<64x64xf32>, vector<2x64xf32> -> vector<2x64xf32>
    %5 = vector.extract_strided_slice %1 {offsets = [0, 0], sizes = [1, 64], strides = [1, 1]} : vector<4x64xf32> to vector<1x64xf32>
    %6 = vector.broadcast %5 : vector<1x64xf32> to vector<2x64xf32>
    %7 = arith.addf %4, %6 : vector<2x64xf32>
    %cst_6 = arith.constant 0.000000e+00 : f32
    %8 = vector.broadcast %cst_6 : f32 to vector<2x64xf32>
    %9 = arith.cmpf oge, %7, %8 : vector<2x64xf32>
    %cst_7 = arith.constant 0.00999999977 : f32
    %10 = vector.broadcast %cst_7 : f32 to vector<2x64xf32>
    %11 = arith.mulf %10, %7 : vector<2x64xf32>
    %12 = arith.select %9, %7, %11 : vector<2x64xi1>, vector<2x64xf32>
    %c1 = arith.constant 1 : index
    %c0_8 = arith.constant 0 : index
    %c0_9 = arith.constant 0 : index
    %13 = vector.load %arg1[%c1, %c0_8, %c0_9] : memref<4x64x64xf32, #tpu.memory_space<vmem>>, vector<1x64x64xf32>
    %14 = vector.shape_cast %13 : vector<1x64x64xf32> to vector<64x64xf32>
    %cst_10 = arith.constant dense<0.000000e+00> : vector<2x64xf32>
    %15 = tpu.matmul %12, %14, %cst_10 {dimension_numbers = #tpu.dot_dimension_numbers<[1], [0], [0], [1], [0, 0, 1, 1], [], []>} : vector<2x64xf32>, vector<64x64xf32>, vector<2x64xf32> -> vector<2x64xf32>
    %16 = vector.extract_strided_slice %1 {offsets = [1, 0], sizes = [1, 64], strides = [1, 1]} : vector<4x64xf32> to vector<1x64xf32>
    %17 = vector.broadcast %16 : vector<1x64xf32> to vector<2x64xf32>
    %18 = arith.addf %15, %17 : vector<2x64xf32>
    %cst_11 = arith.constant 0.000000e+00 : f32
    %19 = vector.broadcast %cst_11 : f32 to vector<2x64xf32>
    %20 = arith.cmpf oge, %18, %19 : vector<2x64xf32>
    %cst_12 = arith.constant 0.00999999977 : f32
    %21 = vector.broadcast %cst_12 : f32 to vector<2x64xf32>
    %22 = arith.mulf %21, %18 : vector<2x64xf32>
    %23 = arith.select %20, %18, %22 : vector<2x64xi1>, vector<2x64xf32>
    %c2 = arith.constant 2 : index
    %c0_13 = arith.constant 0 : index
    %c0_14 = arith.constant 0 : index
    %24 = vector.load %arg1[%c2, %c0_13, %c0_14] : memref<4x64x64xf32, #tpu.memory_space<vmem>>, vector<1x64x64xf32>
    %25 = vector.shape_cast %24 : vector<1x64x64xf32> to vector<64x64xf32>
    %cst_15 = arith.constant dense<0.000000e+00> : vector<2x64xf32>
    %26 = tpu.matmul %23, %25, %cst_15 {dimension_numbers = #tpu.dot_dimension_numbers<[1], [0], [0], [1], [0, 0, 1, 1], [], []>} : vector<2x64xf32>, vector<64x64xf32>, vector<2x64xf32> -> vector<2x64xf32>
    %27 = vector.extract_strided_slice %1 {offsets = [2, 0], sizes = [1, 64], strides = [1, 1]} : vector<4x64xf32> to vector<1x64xf32>
    %28 = vector.broadcast %27 : vector<1x64xf32> to vector<2x64xf32>
    %29 = arith.addf %26, %28 : vector<2x64xf32>
    %cst_16 = arith.constant 0.000000e+00 : f32
    %30 = vector.broadcast %cst_16 : f32 to vector<2x64xf32>
    %31 = arith.cmpf oge, %29, %30 : vector<2x64xf32>
    %cst_17 = arith.constant 0.00999999977 : f32
    %32 = vector.broadcast %cst_17 : f32 to vector<2x64xf32>
    %33 = arith.mulf %32, %29 : vector<2x64xf32>
    %34 = arith.select %31, %29, %33 : vector<2x64xi1>, vector<2x64xf32>
    %c3 = arith.constant 3 : index
    %c0_18 = arith.constant 0 : index
    %c0_19 = arith.constant 0 : index
    %35 = vector.load %arg1[%c3, %c0_18, %c0_19] : memref<4x64x64xf32, #tpu.memory_space<vmem>>, vector<1x64x64xf32>
    %36 = vector.shape_cast %35 : vector<1x64x64xf32> to vector<64x64xf32>
    %cst_20 = arith.constant dense<0.000000e+00> : vector<2x64xf32>
    %37 = tpu.matmul %34, %36, %cst_20 {dimension_numbers = #tpu.dot_dimension_numbers<[1], [0], [0], [1], [0, 0, 1, 1], [], []>} : vector<2x64xf32>, vector<64x64xf32>, vector<2x64xf32> -> vector<2x64xf32>
    %38 = vector.extract_strided_slice %1 {offsets = [3, 0], sizes = [1, 64], strides = [1, 1]} : vector<4x64xf32> to vector<1x64xf32>
    %39 = vector.broadcast %38 : vector<1x64xf32> to vector<2x64xf32>
    %40 = arith.addf %37, %39 : vector<2x64xf32>
    %41 = vector.extract_strided_slice %40 {offsets = [0, 0], sizes = [2, 16], strides = [1, 1]} : vector<2x64xf32> to vector<2x16xf32>
    %42 = vector.extract_strided_slice %40 {offsets = [0, 16], sizes = [2, 16], strides = [1, 1]} : vector<2x64xf32> to vector<2x16xf32>
    %43 = vector.extract_strided_slice %40 {offsets = [0, 32], sizes = [2, 16], strides = [1, 1]} : vector<2x64xf32> to vector<2x16xf32>
    %44 = vector.extract_strided_slice %40 {offsets = [0, 48], sizes = [2, 16], strides = [1, 1]} : vector<2x64xf32> to vector<2x16xf32>
    %45 = arith.maximumf %41, %42 : vector<2x16xf32>
    %46 = arith.maximumf %45, %43 : vector<2x16xf32>
    %47 = arith.maximumf %46, %44 : vector<2x16xf32>
    %48 = tpu.concatenate %47, %47, %47, %47 in 1 : vector<2x16xf32>, vector<2x16xf32>, vector<2x16xf32>, vector<2x16xf32> -> vector<2x64xf32>
    %49 = arith.subf %40, %48 : vector<2x64xf32>
    %50 = math.exp %49 : vector<2x64xf32>
    %51 = vector.extract_strided_slice %50 {offsets = [0, 0], sizes = [2, 16], strides = [1, 1]} : vector<2x64xf32> to vector<2x16xf32>
    %52 = vector.extract_strided_slice %50 {offsets = [0, 16], sizes = [2, 16], strides = [1, 1]} : vector<2x64xf32> to vector<2x16xf32>
    %53 = vector.extract_strided_slice %50 {offsets = [0, 32], sizes = [2, 16], strides = [1, 1]} : vector<2x64xf32> to vector<2x16xf32>
    %54 = vector.extract_strided_slice %50 {offsets = [0, 48], sizes = [2, 16], strides = [1, 1]} : vector<2x64xf32> to vector<2x16xf32>
    %55 = arith.addf %51, %52 : vector<2x16xf32>
    %56 = arith.addf %55, %53 : vector<2x16xf32>
    %57 = arith.addf %56, %54 : vector<2x16xf32>
    %58 = tpu.concatenate %57, %57, %57, %57 in 1 : vector<2x16xf32>, vector<2x16xf32>, vector<2x16xf32>, vector<2x16xf32> -> vector<2x64xf32>
    %59 = tpu.reciprocal %58 {approx = true} : vector<2x64xf32> -> vector<2x64xf32>
    %60 = arith.mulf %58, %59 : vector<2x64xf32>
    %cst_21 = arith.constant 2.000000e+00 : f32
    %61 = vector.broadcast %cst_21 : f32 to vector<2x64xf32>
    %62 = arith.subf %61, %60 : vector<2x64xf32>
    %63 = arith.mulf %59, %62 : vector<2x64xf32>
    %64 = arith.mulf %50, %63 : vector<2x64xf32>
    %c0_22 = arith.constant 0 : index
    %c0_23 = arith.constant 0 : index
    %65 = vector.load %arg3[%c0_22, %c0_23] : memref<2x64xf32, #tpu.memory_space<vmem>>, vector<2x64xf32>
    tpu.vector_store %arg3[%c0_22, %c0_23], %64 {strides = array<i32>} : memref<2x64xf32, #tpu.memory_space<vmem>>, vector<2x64xf32>,
    return
  }
}

</mosaic_0001>

<bundles_post_ra>
// kernel: tpu_custom_call.1
= control target key start
LH: loop header
LB: loop body
LE: loop exit
PB: predicated region body
PF: predicated region fallthrough
CT: control target
= control target key end

     0   :  { %8 = vsyncpa [#allocation3], 0  ;;  %s849_s0 = inlined_call_operand.hbm [shape: f32[2,64], index: 0, kind: input, shape index: {}]   ;;  %s850_s1 = inlined_call_operand.hbm [shape: f32[4,64,64], index: 1, kind: input, shape index: {}]   ;;  %s851_s2 = inlined_call_operand.vmem [shape: f32[4,64], index: 2, kind: input, shape index: {}]   ;;  %s852_s3 = inlined_call_operand.hbm [shape: f32[2,64], index: 3, kind: output, shape index: {}]  }
   0x1   :  { %9 = vsyncpa [#allocation6], 0 }
   0x2   :  { %10 = vsyncpa [#allocation4], 0  ;;  %s731_s12 = smov [#allocation2]   ;;  %s732_s14 = smov [#allocation5]  }
   0x3   :  { %s17_s13 = sshll.u32 %s731_s12, 4  ;;  %s26_s15 = sshll.u32 %s732_s14, 4  ;;  %s18_s13 = int_to_ptr.vmem [resolvable:$true] %s17_s13  ;;  %s765_s15 = int_to_ptr.vmem [resolvable:$true] %s26_s15 }
   0x4   :  { %s659_s18 = scalar_lea.hbm %s849_s0, 32 }
   0x5   :  { %p660_p0 = scmp.ne.s32.totalorder %s849_s0, %s659_s18  ;;  %p663_p1 = scmp.lt.u32.totalorder %s659_s18, %s849_s0 }
   0x7   :  { %p665_p2 = pnand %p663_p1, %p660_p0 }
   0x9   :  { %668 = shalt.err (!%p665_p2)
}
   0xa   :  { %s669_s23 = scalar_lea.vmem %s18_s13, 32  ;;  %p674_p4 = scmp.lt.s32.totalorder %s18_s13, %s18_s13 }
   0xb   :  { %p670_p3 = scmp.ne.s32.totalorder %s18_s13, %s669_s23  ;;  %p675_p5 = scmp.lt.s32.totalorder %s669_s23, %s669_s23 }
   0xd   :  { %p676_p6 = por %p675_p5, %p674_p4 }
   0xf   :  { %p677_p7 = pnand %p676_p6, %p670_p3 }
  0x11   :  { %680 = shalt.err (!%p677_p7)
}
  0x12   :  { %20 = dma.hbm_to_vmem [thread:$0]  %s849_s0, 32, %s18_s13, [#allocation3]  }
  0x13   :  { %s681_s28 = scalar_lea.hbm %s850_s1, 4096 }
  0x14   :  { %p682_p8 = scmp.ne.s32.totalorder %s850_s1, %s681_s28  ;;  %p685_p9 = scmp.lt.u32.totalorder %s681_s28, %s850_s1 }
  0x16   :  { %p687_p10 = pnand %p685_p9, %p682_p8 }
  0x18   :  { %690 = shalt.err (!%p687_p10)
}
  0x19   :  { %s691_s6 = scalar_lea.vmem %s765_s15, 4096  ;;  %p696_p12 = scmp.lt.s32.totalorder %s765_s15, %s765_s15 }
  0x1a   :  { %p692_p11 = scmp.ne.s32.totalorder %s765_s15, %s691_s6  ;;  %p697_p13 = scmp.lt.s32.totalorder %s691_s6, %s691_s6 }
  0x1c   :  { %p698_p0 = por %p697_p13, %p696_p12 }
  0x1e   :  { %p699_p1 = pnand %p698_p0, %p692_p11 }
  0x20   :  { %702 = shalt.err (!%p699_p1)
}
  0x21   :  { %s733_s0 = smov 128   ;;  %s734_s7 = smov 8  }
  0x22   :  { %32 = dma.hbm_to_vmem [thread:$0]  %s850_s1, 4096, %s765_s15, [#allocation6], %s733_s0, %s733_s0, %s734_s7  }
  0x23   :  { %725 = dma.done.wait [#allocation3], 32  }
  0x24   :  { %726 = vsyncadd [#allocation3], 4294967264 }
  0x25   :  { %727 = dma.done.wait [#allocation6], 4096  }
  0x26   :  { %728 = vsyncadd [#allocation6], 4294963200  ;;  %v735_v0 = vmov 0.0|0.0   ;;  %vm736_vm0 = vmmov 0   ;;  %v737_v1 = vmov 0.0   ;;  %v43_v2 = vld [vmem:[#allocation5] sm:$0xff]  ;;  %v51_v36 = vlaneseq }
  0x27   :  { %593 = vmatprep.subr.bf16.mxu0 %v735_v0  ;;  %533 = vmatprep.mubr.msk.f32.mxu0 %vm736_vm0, %v737_v1  ;;  %v44_v3 = vld [vmem:[#allocation5 + $0x8] sm:$0xff]  ;;  %v45_v4 = vld [vmem:[#allocation5 + $0x10] sm:$0xff]  ;;  %v46_v6 = vld [vmem:[#allocation5 + $0x18] sm:$0xff]  ;;  %vm55_vm1 = vcmask 523264   ;;  %s739_s11 = smov 112   ;;  %s740_s12 = smov 96  }
  0x28   :  { %605 = vmatprep.subr.bf16.mxu1 %v735_v0  ;;  %552 = vmatprep.mubr.msk.f32.mxu1 %vm736_vm0, %v737_v1  ;;  %v594_v5 = vpack.c.bf16 %v44_v3, %v43_v2  ;;  %v597_v7 = vpack.c.bf16 %v46_v6, %v45_v4  ;;  %v133_v8 = vld [vmem:[#allocation5 + $0x40] sm:$0xff]  ;;  %v134_v9 = vld [vmem:[#allocation5 + $0x48] sm:$0xff]  ;;  %v135_v10 = vld [vmem:[#allocation5 + $0x50] sm:$0xff]  ;;  %v52_v37 = vshrl.u32 %v51_v36, 7  ;;  %s741_s13 = smov 32   ;;  %s742_s14 = smov 16  }
  0x29   :  { %v47_v11 = vld [vmem:[#allocation5 + $0x20] sm:$0xff]  ;;  %v48_v12 = vld [vmem:[#allocation5 + $0x28] sm:$0xff]  ;;  %v606_v13 = vpack.c.bf16 %v134_v9, %v133_v8  ;;  %v136_v14 = vld [vmem:[#allocation5 + $0x58] sm:$0xff]  ;;  %s743_s15 = smov 48   ;;  %vm419_vm5 = vcmask 130048   ;;  %vm421_vm6 = vcmask 261120  }
  0x2a   :  { %595 = vmatpush3.bf16.msra.mxu0 %v594_v5  ;;  %v609_v15 = vpack.c.bf16 %v136_v14, %v135_v10  ;;  %v600_v16 = vpack.c.bf16 %v48_v12, %v47_v11  ;;  %v137_v17 = vld [vmem:[#allocation5 + $0x60] sm:$0xff]  ;;  %v138_v18 = vld [vmem:[#allocation5 + $0x68] sm:$0xff]  ;;  %v49_v19 = vld [vmem:[#allocation5 + $0x30] sm:$0xff]  ;;  %v53_v38 = vsub.s32 0, %v52_v37  ;;  %v143_v58 = vsub.s32 1, %v52_v37  ;;  %s744_s16 = smov [#allocation7]  }
  0x2b   :  { %596 = vmatprep.subr.bf16.mxu0 %v735_v0  ;;  %607 = vmatpush3.bf16.msra.mxu1 %v606_v13  ;;  %v50_v20 = vld [vmem:[#allocation5 + $0x38] sm:$0xff]  ;;  %v612_v21 = vpack.c.bf16 %v138_v18, %v137_v17  ;;  %v139_v24 = vld [vmem:[#allocation5 + $0x70] sm:$0xff]  ;;  %v222_v27 = vld [vmem:[#allocation5 + $0x80] sm:$0xff]  ;;  %v232_v5 = vsub.s32 2, %v52_v37  ;;  %v321_v11 = vsub.s32 3, %v52_v37  ;;  %vm423_vm7 = vcmask 392192  }
  0x2c   :  { %608 = vmatprep.subr.bf16.mxu1 %v735_v0  ;;  %v603_v22 = vpack.c.bf16 %v50_v20, %v49_v19  ;;  %v41_v23 = vld [vmem:[#allocation2] sm:$0x3]  ;;  %v223_v28 = vld [vmem:[#allocation5 + $0x88] sm:$0xff]  ;;  %v224_v29 = vld [vmem:[#allocation5 + $0x90] sm:$0xff]  ;;  %s467_s17 = sshll.u32 %s744_s16, 4  ;;  %vm459_vm8 = vcmask 517120   ;;  %s468_s17 = int_to_ptr.vmem [resolvable:$true] %s467_s17 }
  0x2d   :  { %v140_v25 = vld [vmem:[#allocation5 + $0x78] sm:$0xff]  ;;  %v618_v30 = vpack.c.bf16 %v223_v28, %v222_v27  ;;  %v226_v33 = vld [vmem:[#allocation5 + $0xa0] sm:$0xff]  ;;  %v227_v34 = vld [vmem:[#allocation5 + $0xa8] sm:$0xff]  ;;  %s703_s18 = scalar_lea.vmem %s468_s17, 32  ;;  %p708_p3 = scmp.lt.s32.totalorder %s468_s17, %s468_s17 }
  0x2e   :  { %598 = vmatpush3.bf16.msra.mxu0 %v597_v7  ;;  %v615_v26 = vpack.c.bf16 %v140_v25, %v139_v24  ;;  %v225_v31 = vld [vmem:[#allocation5 + $0x98] sm:$0xff]  ;;  %v624_v35 = vpack.c.bf16 %v227_v34, %v226_v33  ;;  %v228_v46 = vld [vmem:[#allocation5 + $0xb0] sm:$0xff]  ;;  %v311_v49 = vld [vmem:[#allocation5 + $0xc0] sm:$0xff]  ;;  %p704_p2 = scmp.ne.s32.totalorder %s468_s17, %s703_s18  ;;  %p709_p4 = scmp.lt.s32.totalorder %s703_s18, %s703_s18 }
  0x2f   :  { %599 = vmatprep.subr.bf16.mxu0 %v735_v0  ;;  %610 = vmatpush3.bf16.msra.mxu1 %v609_v15  ;;  %v621_v32 = vpack.c.bf16 %v225_v31, %v224_v29  ;;  %v42_v39 = vld [vmem:[%s851_s2] sm:$0xf]  ;;  %v312_v50 = vld [vmem:[#allocation5 + $0xc8] sm:$0xff]  ;;  %v315_v55 = vld [vmem:[#allocation5 + $0xe0] sm:$0xff]  ;;  %s738_s2 = smov 80  }
  0x30   :  { %611 = vmatprep.subr.bf16.mxu1 %v735_v0  ;;  %v54_v40 = vrot.slane %v42_v39, %v53_v38  ;;  %v229_v47 = vld [vmem:[#allocation5 + $0xb8] sm:$0xff]  ;;  %v313_v51 = vld [vmem:[#allocation5 + $0xd0] sm:$0xff]  ;;  %v630_v52 = vpack.c.bf16 %v312_v50, %v311_v49  ;;  %v316_v56 = vld [vmem:[#allocation5 + $0xe8] sm:$0xff]  ;;  %v144_v59 = vrot.slane %v42_v39, %v143_v58  ;;  %v233_v6 = vrot.slane %v42_v39, %v232_v5  ;;  %p710_p5 = por %p709_p4, %p708_p3 }
  0x31   :  { %v627_v48 = vpack.c.bf16 %v229_v47, %v228_v46  ;;  %v314_v53 = vld [vmem:[#allocation5 + $0xd8] sm:$0xff]  ;;  %v636_v57 = vpack.c.bf16 %v316_v56, %v315_v55  ;;  %v317_v2 = vld [vmem:[#allocation5 + $0xf0] sm:$0xff]  ;;  %v322_v12 = vrot.slane %v42_v39, %v321_v11 }
  0x32   :  { %601 = vmatpush3.bf16.msra.mxu0 %v600_v16  ;;  %v633_v54 = vpack.c.bf16 %v314_v53, %v313_v51  ;;  %v318_v3 = vld [vmem:[#allocation5 + $0xf8] sm:$0xff]  ;;  %p711_p6 = pnand %p710_p5, %p704_p2 }
  0x33   :  { %602 = vmatprep.subr.bf16.mxu0 %v735_v0  ;;  %613 = vmatpush3.bf16.msra.mxu1 %v612_v21  ;;  %v639_v4 = vpack.c.bf16 %v318_v3, %v317_v2 }
  0x34   :  { %614 = vmatprep.subr.bf16.mxu1 %v735_v0 }
  0x36   :  { %604 = vmatpush3.bf16.msra.mxu0 %v603_v22 }
  0x37   :  { %617 = vmatprep.subr.bf16.mxu0 %v735_v0  ;;  %616 = vmatpush3.bf16.msra.mxu1 %v615_v26 }
  0x38   :  { %629 = vmatprep.subr.bf16.mxu1 %v735_v0 }
  0x39   :  { %534 = vmatmul.mubr.msk.f32.vlgmr.msra.gmra.mrb[0].mxu0 %vm55_vm1, %v41_v23 }
  0x3a   :  { %571 = vmatprep.mubr.msk.f32.mxu0 %vm736_vm0, %v737_v1  ;;  %619 = vmatpush3.bf16.msra.mxu0 %v618_v30 }
  0x3b   :  { %620 = vmatprep.subr.bf16.mxu0 %v735_v0 }
  0x3e   :  { %622 = vmatpush3.bf16.msra.mxu0 %v621_v32 }
  0x3f   :  { %623 = vmatprep.subr.bf16.mxu0 %v735_v0 }
  0x42   :  { %625 = vmatpush3.bf16.msra.mxu0 %v624_v35 }
  0x43   :  { %626 = vmatprep.subr.bf16.mxu0 %v735_v0 }
  0x46   :  { %628 = vmatpush3.bf16.msra.mxu0 %v627_v48 }
 0x10c   :  { %v125_v41 = vpop.f32.mrb[0].mxu0 }
 0x10d   :  { %v126_v42 = vadd.f32 %v125_v41, %v54_v40  ;;  %v535_v43 = vpop.f32.mrb[1].mxu0 }
 0x10f   :  { %vm129_vm2 = vcmp.ge.f32.partialorder %v126_v42, 0.0  ;;  %v130_v44 = vmul.f32 0.01, %v126_v42 }
 0x111   :  { %v131_v45 = vsel %vm129_vm2, %v126_v42, %v130_v44 }
 0x112   :  { %553 = vmatmul.mubr.msk.f32.vlgmr.msra.gmra.mrb[0].mxu1 %vm55_vm1, %v131_v45 }
 0x113   :  { %590 = vmatprep.mubr.msk.f32.mxu1 %vm736_vm0, %v737_v1  ;;  %631 = vmatpush3.bf16.msra.mxu1 %v630_v52 }
 0x114   :  { %632 = vmatprep.subr.bf16.mxu1 %v735_v0 }
 0x117   :  { %634 = vmatpush3.bf16.msra.mxu1 %v633_v54 }
 0x118   :  { %635 = vmatprep.subr.bf16.mxu1 %v735_v0 }
 0x11b   :  { %637 = vmatpush3.bf16.msra.mxu1 %v636_v57 }
 0x11c   :  { %638 = vmatprep.subr.bf16.mxu1 %v735_v0 }
 0x11f   :  { %640 = vmatpush3.bf16.msra.mxu1 %v639_v4 }
 0x1e5   :  { %v214_v60 = vpop.f32.mrb[0].mxu1 }
 0x1e6   :  { %v215_v61 = vadd.f32 %v214_v60, %v144_v59  ;;  %v554_v62 = vpop.f32.mrb[1].mxu1 }
 0x1e8   :  { %vm218_vm3 = vcmp.ge.f32.partialorder %v215_v61, 0.0  ;;  %v219_v63 = vmul.f32 0.01, %v215_v61 }
 0x1ea   :  { %v220_v1 = vsel %vm218_vm3, %v215_v61, %v219_v63 }
 0x1eb   :  { %572 = vmatmul.mubr.msk.f32.vlgmr.msra.gmra.mrb[2].mxu0 %vm55_vm1, %v220_v1 }
 0x2be   :  { %v303_v7 = vpop.f32.mrb[2].mxu0 }
 0x2bf   :  { %v304_v8 = vadd.f32 %v303_v7, %v233_v6  ;;  %v573_v9 = vpop.f32.mrb[3].mxu0 }
 0x2c1   :  { %vm307_vm4 = vcmp.ge.f32.partialorder %v304_v8, 0.0  ;;  %v308_v0 = vmul.f32 0.01, %v304_v8 }
 0x2c3   :  { %v309_v10 = vsel %vm307_vm4, %v304_v8, %v308_v0 }
 0x2c4   :  { %591 = vmatmul.mubr.msk.f32.vlgmr.msra.gmra.mrb[2].mxu1 %vm55_vm1, %v309_v10 }
 0x397   :  { %v392_v13 = vpop.f32.mrb[2].mxu1 }
 0x398   :  { %v393_v14 = vadd.f32 %v392_v13, %v322_v12  ;;  %v592_v15 = vpop.f32.mrb[3].mxu1 }
 0x39a   :  { %405 = vrot.lane.b32.xlu1 %v393_v14, %s738_s2  ;;  %397 = vrot.lane.b32.xlu0 %v393_v14, %s739_s11 }
 0x39e   :  { %401 = vrot.lane.b32.xlu0 %v393_v14, %s740_s12 }
 0x40c   :  { %v398_v16 = vpop.permute.xlu0 %397  ;;  %v406_v20 = vpop.permute.xlu1 %405 }
 0x40d   :  { %v400_v17 = vmax.f32 %v393_v14, %v398_v16 }
 0x410   :  { %v402_v18 = vpop.permute.xlu0 %401 }
 0x411   :  { %v404_v19 = vmax.f32 %v400_v17, %v402_v18 }
 0x413   :  { %v408_v21 = vmax.f32 %v404_v19, %v406_v20 }
 0x415   :  { %413 = vrot.lane.b32.xlu0 %v408_v21, %s741_s13  ;;  %410 = vrot.lane.b32.xlu1 %v408_v21, %s742_s14 }
 0x419   :  { %416 = vrot.lane.b32.xlu1 %v408_v21, %s743_s15 }
 0x487   :  { %v411_v22 = vpop.permute.xlu1 %410  ;;  %v414_v23 = vpop.permute.xlu0 %413 }
 0x488   :  { %v420_v24 = vsel %vm419_vm5, %v408_v21, %v411_v22 }
 0x489   :  { %v422_v25 = vsel %vm421_vm6, %v420_v24, %v414_v23 }
 0x48b   :  { %v417_v26 = vpop.permute.xlu1 %416 }
 0x48c   :  { %v424_v27 = vsel %vm423_vm7, %v422_v25, %v417_v26 }
 0x48d   :  { %v425_v28 = vsub.f32 %v393_v14, %v424_v27 }
 0x48f   :  { %v426_v29 = vmul.f32 1.442695, %v425_v28 }
 0x491   :  { %655 = vpow2.f32 %v426_v29 }
 0x49b   :  { %v656_v30 = vpop.eup %655 }
 0x49c   :  { %433 = vrot.lane.b32.xlu1 %v656_v30, %s740_s12  ;;  %429 = vrot.lane.b32.xlu0 %v656_v30, %s739_s11 }
 0x4a0   :  { %437 = vrot.lane.b32.xlu0 %v656_v30, %s738_s2 }
 0x50e   :  { %v430_v31 = vpop.permute.xlu0 %429  ;;  %v434_v33 = vpop.permute.xlu1 %433 }
 0x50f   :  { %v432_v32 = vadd.f32 %v656_v30, %v430_v31 }
 0x511   :  { %v436_v34 = vadd.f32 %v434_v33, %v432_v32 }
 0x512   :  { %v438_v35 = vpop.permute.xlu0 %437 }
 0x513   :  { %v440_v36 = vadd.f32 %v438_v35, %v436_v34 }
 0x515   :  { %445 = vrot.lane.b32.xlu0 %v440_v36, %s741_s13  ;;  %442 = vrot.lane.b32.xlu1 %v440_v36, %s742_s14 }
 0x519   :  { %448 = vrot.lane.b32.xlu1 %v440_v36, %s743_s15 }
 0x587   :  { %v443_v37 = vpop.permute.xlu1 %442  ;;  %v446_v38 = vpop.permute.xlu0 %445 }
 0x588   :  { %v451_v39 = vsel %vm419_vm5, %v440_v36, %v443_v37 }
 0x589   :  { %v452_v40 = vsel %vm421_vm6, %v451_v39, %v446_v38 }
 0x58b   :  { %v449_v41 = vpop.permute.xlu1 %448 }
 0x58c   :  { %v453_v42 = vsel %vm423_vm7, %v452_v40, %v449_v41 }
 0x58d   :  { %657 = vrcp.f32 %v453_v42 }
 0x597   :  { %v658_v43 = vpop.eup %657 }
 0x598   :  { %v455_v44 = vmul.f32 %v658_v43, %v453_v42 }
 0x59a   :  { %v456_v45 = vsub.f32 2.0, %v455_v44 }
 0x59c   :  { %v457_v46 = vmul.f32 %v658_v43, %v456_v45 }
 0x59e   :  { %v458_v47 = vmul.f32 %v656_v30, %v457_v46 }
 0x5a0   :  { %460 = vst.msk [vmem:[#allocation7] sm:$0x3] %vm459_vm8, %v458_v47 }
 0x5a1   :  { %714 = shalt.err (!%p711_p6)
}
 0x5a2   :  { %s715_s21 = scalar_lea.hbm %s852_s3, 32 }
 0x5a3   :  { %p716_p7 = scmp.ne.s32.totalorder %s852_s3, %s715_s21  ;;  %p719_p8 = scmp.lt.u32.totalorder %s715_s21, %s852_s3 }
 0x5a5   :  { %p721_p9 = pnand %p719_p8, %p716_p7 }
 0x5a7   :  { %724 = shalt.err (!%p721_p9)
}
 0x5a8   :  { %470 = dma.vmem_to_hbm [thread:$0]  %s468_s17, 32, %s852_s3, [#allocation4]  }
 0x5a9   :  { %729 = dma.done.wait [#allocation4], 32  }
 0x5aa   :  { %730 = vsyncadd [#allocation4], 4294967264 }
 0x5ab   :  { %474 = vsyncpa [#allocation3], 1 }
 0x5ac   :  { %475 = vsyncpa [#allocation6], 1 }
 0x5ad   :  { %476 = vsyncpa [#allocation4], 1 }

</bundles_post_ra>
